<compile_context>
chip_gen: v5e
topology: v5e:2x2
jax: 0.10.0
libtpu: 0.0.40
codegen_flags: <defaults>
</compile_context>

<pallas_src>
import jax
import jax.numpy as jnp
from jax import lax
from jax.experimental import pallas as pl
from jax.experimental.pallas import tpu as pltpu


def _round_up(n: int, m: int) -> int:
    return ((n + m - 1) // m) * m


def mlp_kernel(x_ref, w1_ref, bw_ref, b2_ref, o_ref):
    # x_ref : (TB, D)  batch-major input tile (bf16), straight from HBM
    # w1_ref: (D, D)   first Linear weight, torch (out, in) layout, resident
    # bw_ref: (D, 2)   column 0 = b1, column 1 = W2 row (f32)
    # b2_ref: (1,)     second bias, SMEM scalar (f32)
    # o_ref : (1, TB)  lane-dense output row (f32)
    #
    # Layer 1 on the MXU: contract the feature axis of both operands so the
    # hidden activation lands feature-major, h^T = W1 @ x^T -> (D, TB) with the
    # batch on the lane axis; f32 accumulation.
    h = lax.dot_general(
        w1_ref[...], x_ref[...],
        dimension_numbers=(((1,), (1,)), ((), ())),
        preferred_element_type=jnp.float32,
    )
    h = jnp.maximum(h + bw_ref[:, 0:1], 0.0)                        # (D, TB) f32
    # Layer 2 (out_dim = 1): VPU broadcast-multiply + sublane reduce instead of
    # an MXU matvec that would fill only 1 of the output lanes.
    z = jnp.sum(h * bw_ref[:, 1:2], axis=0, keepdims=True) + b2_ref[0]
    o_ref[...] = jax.nn.sigmoid(z).astype(o_ref.dtype)              # (1, TB)


def prepare_mlp_params(w1, b1, w2, b2, *, compute_dtype=jnp.bfloat16):
    """Run ONCE at model setup (hoisted out of the per-call path).

    w1: (D, D) torch (out, in); b1: (D,); w2: (1, D); b2: (1,).
    """
    D = w1.shape[0]
    w1_c = jnp.asarray(w1, compute_dtype)                                  # (D, D)
    bw = jnp.stack(
        [jnp.asarray(b1, jnp.float32).reshape(D),
         jnp.asarray(w2, jnp.float32).reshape(D)],
        axis=1,
    )                                                                      # (D, 2)
    b2_s = jnp.asarray(b2, jnp.float32).reshape(1)                         # SMEM
    return w1_c, bw, b2_s


def mlp_forward(x, params, *, batch_tile=1024):
    """x: (B, D). Returns (B, 1) float32 (matching the f32 PyTorch module)."""
    w1_c, bw, b2_s = params
    B, D = x.shape
    assert w1_c.shape == (D, D)
    cdt = w1_c.dtype

    # Per-call x plumbing is just a dtype cast (fuses with the upstream
    # producer); no transpose / feature padding is materialized in HBM.
    x_c = jnp.asarray(x, cdt)

    # Tile choice: as large as possible (stay on the HBM roofline instead of
    # the ~0.35 us/grid-step overhead), but keep >= 2 parallel steps when B
    # allows so both v7x TensorCores get work.  Always a multiple of 128.
    tb = min(batch_tile, max(128, _round_up(-(-B // 2), 128)))
    grid = (pl.cdiv(B, tb),)

    itemsize = jnp.dtype(cdt).itemsize
    cost = pl.CostEstimate(
        flops=2 * B * D * D + 3 * B * D,
        transcendentals=B,  # sigmoid
        bytes_accessed=B * D * itemsize + D * D * itemsize + 8 * D + 4 + 4 * B,
    )

    out = pl.pallas_call(
        mlp_kernel,
        out_shape=jax.ShapeDtypeStruct((1, B), jnp.float32),
        grid_spec=pltpu.PrefetchScalarGridSpec(
            num_scalar_prefetch=0,
            grid=grid,
            in_specs=[
                # batch-major x tile; last dim == full array dim (no 128 pad).
                pl.BlockSpec((tb, D), lambda i: (i, 0)),
                # grid-invariant weights: single-buffered (no pointless 2x VMEM).
                pl.BlockSpec((D, D), lambda i: (0, 0),
                             pipeline_mode=pl.Buffered(1)),
                pl.BlockSpec((D, 2), lambda i: (0, 0),
                             pipeline_mode=pl.Buffered(1)),
                pl.BlockSpec(memory_space=pltpu.MemorySpace.SMEM),
            ],
            # lane-dense output row; the partial last block is masked by Pallas.
            out_specs=pl.BlockSpec((1, tb), lambda i: (0, i)),
        ),
        compiler_params=pltpu.CompilerParams(
            dimension_semantics=("parallel",),
            vmem_limit_bytes=64 * 1024 * 1024,  # v5e's scoped default is 16 MiB
        ),
        cost_estimate=cost,
    )(x_c, w1_c, bw, b2_s)

    return out.reshape(B, 1)


def reference_mlp(x, w1, b1, w2, b2):
    h = jnp.maximum(x @ w1.T + b1, 0.0)
    return jax.nn.sigmoid(h @ w2.T + b2)


if __name__ == "__main__":
    key = jax.random.PRNGKey(0)
    # Small, deliberately unaligned shapes: exercises the partial-edge-block
    # path (B % tb != 0) and gives a 2-step "parallel" grid.
    B, D = 300, 20

    kx, k1w, k1b, k2w, k2b = jax.random.split(key, 5)

    # Deterministic init mimicking nn.Linear's U(-1/sqrt(fan_in), 1/sqrt(fan_in)).
    bound1 = 1.0 / jnp.sqrt(jnp.float32(D))
    w1 = jax.random.uniform(k1w, (D, D), jnp.float32, -bound1, bound1)  # (out, in)
    b1 = jax.random.uniform(k1b, (D,), jnp.float32, -bound1, bound1)
    w2 = jax.random.uniform(k2w, (1, D), jnp.float32, -bound1, bound1)  # (out, in)
    b2 = jax.random.uniform(k2b, (1,), jnp.float32, -bound1, bound1)

    x = jax.random.normal(kx, (B, D), jnp.float32)

    # Weights prepared once (bf16 W1, packed f32 b1/w2 columns, f32 b2 scalar).
    params = prepare_mlp_params(w1, b1, w2, b2, compute_dtype=jnp.bfloat16)

    out = jax.block_until_ready(jax.jit(mlp_forward)(x, params))
    assert out.shape == (B, 1) and out.dtype == jnp.float32

    # Check 1: against the full-f32 reference (kernel uses bf16 MXU operands
    # with f32 accumulation, so allow bf16-quantization-level error).
    ref_f32 = reference_mlp(x, w1, b1, w2, b2)
    assert jnp.allclose(out, ref_f32, atol=2e-2, rtol=0.0), (
        float(jnp.max(jnp.abs(out - ref_f32))))

    # Check 2: against a bf16-operand / f32-accumulate matched reference.
    x_b, w1_b = x.astype(jnp.bfloat16), w1.astype(jnp.bfloat16)
    h = jnp.maximum(
        jnp.dot(x_b, w1_b.T, preferred_element_type=jnp.float32) + b1, 0.0)
    ref_bf16 = jax.nn.sigmoid(h @ w2.T + b2)
    assert jnp.allclose(out, ref_bf16, atol=1e-3, rtol=0.0), (
        float(jnp.max(jnp.abs(out - ref_bf16))))

    print("KERNEL_OK")
</pallas_src>

<mosaic_0001>
module attributes {stable_mosaic.version = 11 : i64} {
  func.func @mlp_kernel(%arg0: i32, %arg1: memref<256x20xbf16, #tpu.memory_space<vmem>>, %arg2: memref<20x20xbf16, #tpu.memory_space<vmem>>, %arg3: memref<20x2xf32, #tpu.memory_space<vmem>>, %arg4: memref<1xf32, #tpu.memory_space<smem>>, %arg5: memref<1x256xf32, #tpu.memory_space<vmem>>) attributes {dimension_semantics = [#tpu.dimension_semantics<parallel>], iteration_bounds = array<i64: 2>, scalar_prefetch = 0 : i64, scratch_operands = 0 : i64, tpu.core_type = #tpu.core_type<tc>, window_params = [{transform_indices = @transform_0, window_bounds = array<i64: 256, 20>}, {pipeline_mode = #tpu.pipeline_mode<synchronous>, transform_indices = @transform_1, window_bounds = array<i64: 20, 20>}, {pipeline_mode = #tpu.pipeline_mode<synchronous>, transform_indices = @transform_2, window_bounds = array<i64: 20, 2>}, {transform_indices = @transform_3, window_bounds = array<i64: 1>}, {transform_indices = @transform_4, window_bounds = array<i64: 1, 256>}]} {
    %c0 = arith.constant 0 : index
    %c0_0 = arith.constant 0 : index
    %0 = vector.load %arg2[%c0, %c0_0] : memref<20x20xbf16, #tpu.memory_space<vmem>>, vector<20x20xbf16>
    %c0_1 = arith.constant 0 : index
    %c0_2 = arith.constant 0 : index
    %1 = vector.load %arg1[%c0_1, %c0_2] : memref<256x20xbf16, #tpu.memory_space<vmem>>, vector<256x20xbf16>
    %cst = arith.constant dense<0.000000e+00> : vector<20x256xf32>
    %2 = tpu.matmul %0, %1, %cst {dimension_numbers = #tpu.dot_dimension_numbers<[1], [1], [0], [0], [0, 0, 1, 0], [], []>} : vector<20x20xbf16>, vector<256x20xbf16>, vector<20x256xf32> -> vector<20x256xf32>
    %c0_3 = arith.constant 0 : index
    %c0_4 = arith.constant 0 : index
    %3 = vector.load %arg3[%c0_3, %c0_4] : memref<20x2xf32, #tpu.memory_space<vmem>>, vector<20x1xf32>
    %4 = vector.broadcast %3 : vector<20x1xf32> to vector<20x256xf32>
    %5 = arith.addf %2, %4 : vector<20x256xf32>
    %cst_5 = arith.constant 0.000000e+00 : f32
    %6 = vector.broadcast %cst_5 : f32 to vector<20x256xf32>
    %7 = arith.maximumf %5, %6 : vector<20x256xf32>
    %c0_6 = arith.constant 0 : index
    %c1 = arith.constant 1 : index
    %8 = vector.load %arg3[%c0_6, %c1] : memref<20x2xf32, #tpu.memory_space<vmem>>, vector<20x1xf32>
    %9 = vector.broadcast %8 : vector<20x1xf32> to vector<20x256xf32>
    %10 = arith.mulf %7, %9 : vector<20x256xf32>
    %cst_7 = arith.constant dense<0.000000e+00> : vector<256xf32>
    %11 = vector.multi_reduction <add>, %10, %cst_7 [0] : vector<20x256xf32> to vector<256xf32>
    %12 = vector.shape_cast %11 : vector<256xf32> to vector<1x256xf32>
    %c0_8 = arith.constant 0 : index
    %13 = memref.load %arg4[%c0_8] : memref<1xf32, #tpu.memory_space<smem>>
    %14 = vector.broadcast %13 : f32 to vector<1x256xf32>
    %15 = arith.addf %12, %14 : vector<1x256xf32>
    %16 = arith.negf %15 : vector<1x256xf32>
    %17 = math.exp %16 : vector<1x256xf32>
    %cst_9 = arith.constant 1.000000e+00 : f32
    %18 = vector.broadcast %cst_9 : f32 to vector<1x256xf32>
    %19 = arith.addf %18, %17 : vector<1x256xf32>
    %20 = arith.divf %18, %19 : vector<1x256xf32>
    %c0_10 = arith.constant 0 : index
    %c0_11 = arith.constant 0 : index
    %21 = vector.load %arg5[%c0_10, %c0_11] : memref<1x256xf32, #tpu.memory_space<vmem>>, vector<1x256xf32>
    tpu.vector_store %arg5[%c0_10, %c0_11], %20 {strides = array<i32>} : memref<1x256xf32, #tpu.memory_space<vmem>>, vector<1x256xf32>,
    return
  }
  func.func @transform_0(%arg0: i32) -> (i32, i32) {
    %c0_i32 = arith.constant 0 : i32
    %c0_i32_0 = arith.constant 0 : i32
    return %arg0, %c0_i32 : i32, i32
  }
  func.func @transform_1(%arg0: i32) -> (i32, i32) {
    %c0_i32 = arith.constant 0 : i32
    %c0_i32_0 = arith.constant 0 : i32
    %c0_i32_1 = arith.constant 0 : i32
    return %c0_i32, %c0_i32_0 : i32, i32
  }
  func.func @transform_2(%arg0: i32) -> (i32, i32) {
    %c0_i32 = arith.constant 0 : i32
    %c0_i32_0 = arith.constant 0 : i32
    %c0_i32_1 = arith.constant 0 : i32
    return %c0_i32, %c0_i32_0 : i32, i32
  }
  func.func @transform_3(%arg0: i32) -> i32 {
    %c0_i32 = arith.constant 0 : i32
    %c0_i32_0 = arith.constant 0 : i32
    return %c0_i32 : i32
  }
  func.func @transform_4(%arg0: i32) -> (i32, i32) {
    %c0_i32 = arith.constant 0 : i32
    %c0_i32_0 = arith.constant 0 : i32
    return %c0_i32, %arg0 : i32, i32
  }
}

</mosaic_0001>

<bundles_post_ra>
// kernel: mlp_forward.1
= control target key start
LH: loop header
LB: loop body
LE: loop exit
PB: predicated region body
PF: predicated region fallthrough
CT: control target
= control target key end

     0   :  { %s1080_s0 = inlined_call_operand.vmem [shape: bf16[300,20], index: 0, kind: input, shape index: {}]   ;;  %s1081_s1 = inlined_call_operand.vmem [shape: bf16[20,20], index: 1, kind: input, shape index: {}]   ;;  %s1082_s2 = inlined_call_operand.vmem [shape: f32[20,2], index: 2, kind: input, shape index: {}]   ;;  %s1083_s3 = inlined_call_operand.<no memory space> [shape: f32[1], index: 3, kind: input, shape index: {}]   ;;  %s1084_s4 = inlined_call_operand.hbm [shape: f32[1,300], index: 4, kind: output, shape index: {}]  }
   0x1   :  { %9 = sst [smem:[#allocation2]] %s1083_s3 }
   0x2   :  { %10 = vsyncpa [#allocation4], 0 }
   0x3   :  { %12 = vsyncpa [#allocation4 + $0x1], 0  ;;  %s909_s17 = smov 0   ;;  %s911_s18 = smov 0  }
   0x4   :  { %s913_s19 = smov 0   ;;  %s915_s20 = smov 0  }
   0x5 LB: > { %s930_s3 = sadd.s32 4294967295, %s876_s20   ;;  %s631_s21 = sadd.s32 4294967294, %s876_s20   ;;  %s876_s20 = sphi %s915_s20, %s1092_s20   ;;  %s872_s19 = sphi %s913_s19, %s1091_s19   ;;  %s868_s18 = sphi %s911_s18, %s1090_s18   ;;  %s864_s17 = sphi %s909_s17, %s1089_s17  }
   0x6   : > { %s934_s22 = sadd.s32 1, %s876_s20   ;;  %s114_s23 = sadd.s32 1, %s872_s19 }
   0x7   : > { %s111_s24 = ssub.s32 %s876_s20, %s934_s22  ;;  %p124_p0 = scmp.ne.s32.totalorder %s872_s19, %s868_s18 }
   0x8   : > { %p112_p1 = scmp.eq.s32.totalorder %s111_s24, 0  ;;  %p125_p2 = scmp.eq.s32.totalorder %s930_s3, 1 }
   0x9   : > { %p130_p3 = scmp.ne.s32.totalorder %s868_s18, %s864_s17  ;;  %p131_p4 = scmp.eq.s32.totalorder %s631_s21, 1 }
   0xa   : > { %s945_s25 = scalar_select %p112_p1, %s872_s19, %s114_s23  }
   0xb   : > { %p947_p5 = por %p125_p2, %p124_p0  ;;  %p951_p6 = por %p131_p4, %p130_p3 }
   0xc   : > { %p634_p7 = scmp.ge.s32.totalorder %s876_s20, 1  ;;  %p175_p8 = scmp.lt.s32.totalorder %s876_s20, 3 }
   0xe   : > { %p176_p9 = pnand %p634_p7, %p175_p8 }
   0xf   : > { %s636_s28 = sshll.u32 (!%p176_p9), %s930_s3, 5  ;;  %s202_s21 = sand.u32 (!%p176_p9), 1, %s868_s18  }
  0x10   : > { %179 = sbr.rel (%p176_p9) target bundleno = 309 (0x135), region = 36  ;;  %p210_p10 = scmp.lt.s32.totalorder (!%p176_p9), %s636_s28, 37 }
  0x11   : > { %s498_s23 = sld [smem:[#allocation2]] (!%p176_p9)  ;;  %s635_s24 = sshll.u32 (!%p176_p9), %s202_s21, 1 }
  0x15   : > { %s1094_s28 = smov (!%p210_p10, %s636_s28), 37  ;;  %vm364_vm0 = vcmask 162816   ;;  %v258_v20 = vld [vmem:[%s1082_s2] sm:$0xff]  ;;  %v260_v21 = vld [vmem:[%s1082_s2 + $0x10] sm:$0xf]  ;;  %v878_v24 = vmov 0  }
  0x16   : > { %s637_s29 = sshll.u32 %s1094_s28, 2  ;;  %790 = vset.pattern.permute.xlu0 %v878_v24  ;;  %791 = vset.pattern.permute.xlu1 %v878_v24  ;;  %v259_v25 = vld [vmem:[%s1082_s2 + $0x8] sm:$0xff]  ;;  %v879_v26 = vmov 1   ;;  %v717_v39 = vld [vmem:[%s1081_s1] sm:$0xff]  ;;  %vm480_vm1 = vcmask 1043456   ;;  %vm543_vm9 = vcmask 1040384  }
  0x17   : > { %s961_s6 = scalar_lea.vmem %s1080_s0, %s637_s29  ;;  %263 = vperm.xlu0 %790, %v258_v20   ;;  %273 = vperm.xlu1 %791, %v260_v21   ;;  %v225_v35 = vld [vmem:[%s1081_s1 + $0x8] sm:$0x3]  ;;  %v499_v24 = vstv %s498_s23  ;;  %s204_s28 = scalar_lea.vmem [#allocation3], %s635_s24 }
  0x18   : > { %v725_v0 = vld [vmem:[%s961_s6 + $0x38] sm:$0xff]  ;;  %v724_v4 = vld [vmem:[%s961_s6 + $0x30] sm:$0xff]  ;;  %v723_v8 = vld [vmem:[%s961_s6 + $0x28] sm:$0xff]  ;;  %793 = vset.pattern.permute.xlu2 %v879_v26  ;;  %v281_v38 = vunpack.c.l.b16 %v225_v35  ;;  %s1025_s29 = scalar_lea.sflag [#allocation4], %s202_s21  ;;  %s713_s30 = sshll.u32 (%p947_p5), %s930_s3, 1 }
  0x19   : > { %v733_v1 = vld [vmem:[%s961_s6 + $0x78] sm:$0xff]  ;;  %v393_v2 = vsel %vm364_vm0, %v725_v0, 0  ;;  %v732_v5 = vld [vmem:[%s961_s6 + $0x70] sm:$0xff]  ;;  %v390_v6 = vsel %vm364_vm0, %v724_v4, 0  ;;  %v731_v9 = vld [vmem:[%s961_s6 + $0x68] sm:$0xff]  ;;  %v387_v10 = vsel %vm364_vm0, %v723_v8, 0  ;;  %466 = vperm.xlu2 %793, %v259_v25  }
  0x1a   : > { %v417_v3 = vsel %vm364_vm0, %v733_v1, 0  ;;  %419 = vmatpush.bf16.xpose.msra.mxu0 %v393_v2  ;;  %734 = vmatpush.bf16.xpose.msra.mxu2 %v393_v2  ;;  %v414_v7 = vsel %vm364_vm0, %v732_v5, 0  ;;  %v411_v11 = vsel %vm364_vm0, %v731_v9, 0  ;;  %v722_v12 = vld [vmem:[%s961_s6 + $0x20] sm:$0xff]  ;;  %v721_v16 = vld [vmem:[%s961_s6 + $0x18] sm:$0xff]  ;;  %v720_v22 = vld [vmem:[%s961_s6 + $0x10] sm:$0xff]  ;;  %v283_v40 = vpack.c.b16 %v281_v38, %v281_v38 }
  0x1b   : > { %437 = vmatpush.bf16.xpose.msra.mxu1 %v417_v3  ;;  %742 = vmatpush.bf16.xpose.msra.mxu3 %v417_v3  ;;  %v730_v13 = vld [vmem:[%s961_s6 + $0x60] sm:$0xff]  ;;  %v384_v14 = vsel %vm364_vm0, %v722_v12, 0  ;;  %v729_v17 = vld [vmem:[%s961_s6 + $0x58] sm:$0xff]  ;;  %v381_v18 = vsel %vm364_vm0, %v721_v16, 0  ;;  %v728_v23 = vld [vmem:[%s961_s6 + $0x50] sm:$0xff]  ;;  %v378_v27 = vsel %vm364_vm0, %v720_v22, 0 }
  0x1c   : > { %v408_v15 = vsel %vm364_vm0, %v730_v13, 0  ;;  %v405_v19 = vsel %vm364_vm0, %v729_v17, 0  ;;  %v402_v28 = vsel %vm364_vm0, %v728_v23, 0  ;;  %v719_v29 = vld [vmem:[%s961_s6 + $0x8] sm:$0xff]  ;;  %v718_v33 = vld [vmem:[%s961_s6] sm:$0xff]  ;;  %s560_s5 = ssub.s32 (%p947_p5), 3, %s713_s30 }
  0x1d   : > { %v727_v30 = vld [vmem:[%s961_s6 + $0x48] sm:$0xff]  ;;  %v375_v31 = vsel %vm364_vm0, %v719_v29, 0  ;;  %v726_v34 = vld [vmem:[%s961_s6 + $0x40] sm:$0xff]  ;;  %v372_v36 = vsel %vm364_vm0, %v718_v33, 0  ;;  %p561_p11 = scmp.lt.s32.totalorder (%p947_p5), %s560_s5, 2 }
  0x1e   : > { %v399_v32 = vsel %vm364_vm0, %v727_v30, 0  ;;  %v396_v37 = vsel %vm364_vm0, %v726_v34, 0 }
  0x1f   : > { %268 = vperm.xlu0 %790, %v259_v25   ;;  %792 = vset.pattern.permute.xlu1 %v879_v26 }
  0x20   : > { %462 = vperm.xlu1 %792, %v258_v20  }
  0x21   : > { %470 = vperm.xlu2 %793, %v260_v21  }
  0x22   : > { %420 = vmatpush.bf16.xpose.msra.mxu0 %v390_v6  ;;  %735 = vmatpush.bf16.xpose.msra.mxu2 %v390_v6 }
  0x23   : > { %438 = vmatpush.bf16.xpose.msra.mxu1 %v414_v7  ;;  %743 = vmatpush.bf16.xpose.msra.mxu3 %v414_v7 }
  0x27   : > { %794 = vset.pattern.permute.xlu0 %v879_v26 }
  0x2a   : > { %421 = vmatpush.bf16.xpose.msra.mxu0 %v387_v10  ;;  %736 = vmatpush.bf16.xpose.msra.mxu2 %v387_v10 }
  0x2b   : > { %439 = vmatpush.bf16.xpose.msra.mxu1 %v411_v11  ;;  %744 = vmatpush.bf16.xpose.msra.mxu3 %v411_v11 }
  0x32   : > { %422 = vmatpush.bf16.xpose.msra.mxu0 %v384_v14  ;;  %737 = vmatpush.bf16.xpose.msra.mxu2 %v384_v14 }
  0x33   : > { %440 = vmatpush.bf16.xpose.msra.mxu1 %v408_v15  ;;  %745 = vmatpush.bf16.xpose.msra.mxu3 %v408_v15 }
  0x3a   : > { %423 = vmatpush.bf16.xpose.msra.mxu0 %v381_v18  ;;  %738 = vmatpush.bf16.xpose.msra.mxu2 %v381_v18 }
  0x3b   : > { %441 = vmatpush.bf16.xpose.msra.mxu1 %v405_v19  ;;  %746 = vmatpush.bf16.xpose.msra.mxu3 %v405_v19 }
  0x42   : > { %424 = vmatpush.bf16.xpose.msra.mxu0 %v378_v27  ;;  %739 = vmatpush.bf16.xpose.msra.mxu2 %v378_v27 }
  0x43   : > { %442 = vmatpush.bf16.xpose.msra.mxu1 %v402_v28  ;;  %747 = vmatpush.bf16.xpose.msra.mxu3 %v402_v28 }
  0x4a   : > { %425 = vmatpush.bf16.xpose.msra.mxu0 %v375_v31  ;;  %740 = vmatpush.bf16.xpose.msra.mxu2 %v375_v31 }
  0x4b   : > { %443 = vmatpush.bf16.xpose.msra.mxu1 %v399_v32  ;;  %748 = vmatpush.bf16.xpose.msra.mxu3 %v399_v32 }
  0x52   : > { %426 = vmatpush.bf16.xpose.msra.mxu0 %v372_v36  ;;  %741 = vmatpush.bf16.xpose.msra.mxu2 %v372_v36 }
  0x53   : > { %444 = vmatpush.bf16.xpose.msra.mxu1 %v396_v37  ;;  %749 = vmatpush.bf16.xpose.msra.mxu3 %v396_v37 }
  0x59   : > { %706 = vmatmul.msk.bf16.vlgmr.msra.gmra.mxu0 %vm364_vm0, %v717_v39  ;;  %707 = vmatmul.msk.bf16.vlgmr.msra.gmra.mxu2 %vm364_vm0, %v283_v40 }
  0x5a   : > { %708 = vmatmul.msk.bf16.vlgmr.msra.gmra.mxu1 %vm364_vm0, %v717_v39  ;;  %709 = vmatmul.msk.bf16.vlgmr.msra.gmra.mxu3 %vm364_vm0, %v283_v40 }
  0x73   : > { %v467_v44 = vpop.permute.xlu2 %466 }
  0x7b   : > { %v471_v62 = vpop.permute.xlu2 %470 }
  0x89   : > { %v264_v41 = vpop.permute.xlu0 %263  ;;  %v274_v42 = vpop.permute.xlu1 %273 }
  0x91   : > { %v269_v51 = vpop.permute.xlu0 %268 }
  0x92   : > { %v463_v59 = vpop.permute.xlu1 %462 }
  0xd6   : > { %v428_v43 = vpop.f32.mrf.mxu0 }
  0xd7   : > { %v446_v45 = vpop.f32.mrf.mxu1  ;;  %v429_v46 = vadd.f32 %v428_v43, %v264_v41 }
  0xd8   : > { %v447_v47 = vadd.f32 %v446_v45, %v264_v41 }
  0xd9   : > { %v455_v54 = vmax.f32 %v429_v46, 0.0 }
  0xda   : > { %v456_v58 = vmax.f32 %v447_v47, 0.0 }
  0xdb   : > { %v473_v2 = vmul.f32 %v463_v59, %v455_v54 }
  0xdc   : > { %v433_v48 = vpop.f32.mrf.mxu2  ;;  %v474_v5 = vmul.f32 %v463_v59, %v456_v58 }
  0xdd   : > { %v434_v49 = vadd.f32 %v433_v48, %v274_v42  ;;  %v451_v50 = vpop.f32.mrf.mxu3 }
  0xde   : > { %v452_v52 = vadd.f32 %v451_v50, %v274_v42  ;;  %v430_v53 = vpop.f32.mrf.mxu0 }
  0xdf   : > { %v459_v55 = vmax.f32 %v434_v49, 0.0  ;;  %v431_v56 = vadd.f32 %v430_v53, %v269_v51  ;;  %v448_v57 = vpop.f32.mrf.mxu1 }
  0xe0   : > { %v460_v60 = vmax.f32 %v452_v52, 0.0  ;;  %v449_v61 = vadd.f32 %v448_v57, %v269_v51  ;;  %v546_v51 = vlaneseq }
  0xe1   : > { %v457_v63 = vmax.f32 %v431_v56, 0.0  ;;  %v477_v0 = vmul.f32 %v471_v62, %v459_v55 }
  0xe2   : > { %v458_v1 = vmax.f32 %v449_v61, 0.0  ;;  %v478_v3 = vmul.f32 %v471_v62, %v460_v60  ;;  %vm548_vm11 = vcmp.lt.s32.totalorder %v546_v51, 256 }
  0xe3   : > { %v475_v4 = vmul.f32 %v467_v44, %v457_v63  ;;  %v481_v10 = vsel %vm480_vm1, %v477_v0, 0.0 }
  0xe4   : > { %v476_v6 = vmul.f32 %v467_v44, %v458_v1  ;;  %v435_v7 = vpop.f32.mrf.mxu2  ;;  %v490_v12 = vsel %vm480_vm1, %v478_v3, 0.0 }
  0xe5   : > { %v479_v8 = vadd.f32 %v475_v4, %v473_v2  ;;  %v453_v9 = vpop.f32.mrf.mxu3 }
  0xe6   : > { %v489_v11 = vadd.f32 %v476_v6, %v474_v5 }
  0xe7   : > { %v482_v13 = vadd.f32 %v481_v10, %v479_v8 }
  0xe8   : > { %v491_v14 = vadd.f32 %v490_v12, %v489_v11 }
  0xe9   : > { %v483_v15 = vrot.slane %v482_v13, 4 }
  0xea   : > { %v492_v16 = vrot.slane %v491_v14, 4 }
  0xeb   : > { %v484_v17 = vadd.f32 %v483_v15, %v482_v13 }
  0xec   : > { %v493_v18 = vadd.f32 %v492_v16, %v491_v14 }
  0xed   : > { %v485_v19 = vrot.slane %v484_v17, 2 }
  0xee   : > { %v494_v20 = vrot.slane %v493_v18, 2 }
  0xef   : > { %v486_v21 = vadd.f32 %v485_v19, %v484_v17 }
  0xf0   : > { %v495_v22 = vadd.f32 %v494_v20, %v493_v18 }
  0xf1   : > { %v487_v23 = vrot.slane %v486_v21, 1 }
  0xf2   : > { %v496_v25 = vrot.slane %v495_v22, 1 }
  0xf3   : > { %v488_v26 = vadd.f32 %v487_v23, %v486_v21 }
  0xf4   : > { %v497_v27 = vadd.f32 %v496_v25, %v495_v22 }
  0xf5   : > { %v500_v28 = vadd.f32 %v499_v24, %v488_v26 }
  0xf6   : > { %v501_v29 = vadd.f32 %v499_v24, %v497_v27 }
  0xf7   : > { %v710_v30 = vmul.f32 -1.442695, %v500_v28 }
  0xf8   : > { %v711_v31 = vmul.f32 -1.442695, %v501_v29 }
  0xf9   : > { %795 = vpow2.f32 %v710_v30 }
  0xfa   : > { %797 = vpow2.f32 %v711_v31 }
  0xff   : > { %v796_v32 = vpop.eup %795 }
 0x100   : > { %v798_v33 = vpop.eup %797  ;;  %v508_v34 = vadd.f32 1.0, %v796_v32 }
 0x101   : > { %v509_v35 = vadd.f32 1.0, %v798_v33 }
 0x102   : > { %799 = vrcp.f32 %v508_v34  ;;  %vm515_vm4 = vweird.f32 %v508_v34  ;;  %v521_v47 = vand.u32 2147483648, %v508_v34  ;;  %v519_v49 = vand.u32 2147483647, %v508_v34 }
 0x103   : > { %801 = vrcp.f32 %v509_v35  ;;  %v536_v43 = vand.u32 2147483648, %v509_v35  ;;  %v534_v45 = vand.u32 2147483647, %v509_v35  ;;  %vm530_vm6 = vweird.f32 %v509_v35 }
 0x104   : > { %v522_v55 = vor.u32 1.1754944e-38, %v521_v47  ;;  %vm520_vm10 = vcmp.eq.f32.partialorder %v519_v49, 8.507059e+37 }
 0x105   : > { %v537_v52 = vor.u32 1.1754944e-38, %v536_v43  ;;  %vm535_vm8 = vcmp.eq.f32.partialorder %v534_v45, 8.507059e+37 }
 0x108   : > { %v800_v36 = vpop.eup %799 }
 0x109   : > { %v802_v37 = vpop.eup %801  ;;  %v511_v38 = vmul.f32 %v800_v36, %v508_v34  ;;  %vm516_vm2 = vweird.f32 %v800_v36 }
 0x10a   : > { %v526_v39 = vmul.f32 %v802_v37, %v509_v35  ;;  %vm531_vm3 = vweird.f32 %v802_v37  ;;  %vm1015_vm5 = vmor %vm515_vm4, %vm516_vm2 }
 0x10b   : > { %v512_v40 = vsub.f32 1.0, %v511_v38  ;;  %vm532_vm7 = vmor %vm530_vm6, %vm531_vm3 }
 0x10c   : > { %v527_v41 = vsub.f32 1.0, %v526_v39 }
 0x10d   : > { %v513_v42 = vmul.f32 %v800_v36, %v512_v40 }
 0x10e   : > { %v528_v44 = vmul.f32 %v802_v37, %v527_v41 }
 0x10f   : > { %v514_v46 = vadd.f32 %v800_v36, %v513_v42 }
 0x110   : > { %v529_v50 = vadd.f32 %v802_v37, %v528_v44 }
 0x111   : > { %v518_v53 = vsel %vm1015_vm5, %v800_v36, %v514_v46 }
 0x112   : > { %v533_v54 = vsel %vm532_vm7, %v802_v37, %v529_v50  ;;  %v523_v58 = vsel %vm520_vm10, %v522_v55, %v518_v53 }
 0x113   : > { %v538_v56 = vsel %vm535_vm8, %v537_v52, %v533_v54  ;;  %558 = sbr.rel (!%p947_p5) target bundleno = 309 (0x135), region = 40 }
 0x114   : > { %v542_v57 = vrot.slane %v538_v56, 7 }
 0x116   : > { %v544_v59 = vsel %vm543_vm9, %v523_v58, %v542_v57 }
 0x117   : > { %550 = vst.msk [vmem:[%s204_s28] sm:$0x3] %vm548_vm11, %v544_v59 }
 0x118   : > { %s1096_s5 = smov (!%p561_p11, %s560_s5), 2 }
 0x119   : > { %s563_s6 = ssub.s32 2, %s1096_s5 }
 0x11a   : > { %s564_s7 = sshll.u32 %s563_s6, 4 }
 0x11b   : > { %565 = vsyncadd %s1025_s29, %s564_s7  ;;  %p714_p12 = scmp.ne.s32.totalorder %s1096_s5, 0  ;;  %s567_s26 = scalar_lea.hbm %s1084_s4, %s713_s30 }
 0x11c   : > { %s568_s10 = sshll.u32 %s1096_s5, 4  ;;  %s1039_s11 = sshll.u32 %s204_s28, 4  ;;  %s570_s11 = int_to_ptr.vmem [resolvable:$true] %s1039_s11 }
 0x11d   : > { %s571_s3 = sshll.u32 %s567_s26, 4  ;;  %s803_s12 = sshra.s32 %s570_s11, 4  ;;  %s572_s3 = int_to_ptr.hbm [resolvable:$true] %s571_s3  ;;  %s804_s12 = int_to_ptr.vmem [resolvable:$true] %s803_s12 }
 0x11e   : > { %s805_s13 = sshrl.u32 %s568_s10, 4  ;;  %s880_s15 = smov [#allocation3]  }
 0x11f   : > { %s810_s14 = scalar_lea.vmem %s804_s12, %s805_s13  ;;  %s814_s16 = scalar_lea.vmem %s880_s15, 4 }
 0x120   : > { %p811_p13 = scmp.ne.s32.totalorder %s804_s12, %s810_s14  ;;  %p816_p2 = scmp.lt.s32.totalorder %s814_s16, %s810_s14 }
 0x122   : > { %p812_p0 = pnand %p811_p13, %p714_p12 }
 0x124   : > { %p813_p1 = pneg %p812_p0 }
 0x126   : > { %p818_p3 = pnand %p816_p2, %p813_p1 }
 0x128   : > { %821 = shalt.err (!%p818_p3)
}
 0x129   : > { %s822_s21 = sshra.s32 %s572_s3, 4  ;;  %s833_s30 = scalar_lea.hbm %s1084_s4, 3  ;;  %s823_s21 = int_to_ptr.hbm [resolvable:$true] %s822_s21 }
 0x12a   : > { %s829_s23 = scalar_lea.hbm %s823_s21, %s805_s13  ;;  %p834_p8 = scmp.lt.s32.totalorder %s823_s21, %s1084_s4 }
 0x12b   : > { %p830_p4 = scmp.ne.s32.totalorder %s823_s21, %s829_s23  ;;  %p835_p9 = scmp.lt.s32.totalorder %s833_s30, %s829_s23 }
 0x12d   : > { %p831_p5 = pnand %p830_p4, %p714_p12  ;;  %p836_p10 = por %p835_p9, %p834_p8 }
 0x12f   : > { %p832_p7 = pneg %p831_p5 }
 0x131   : > { %p837_p11 = pnand %p836_p10, %p832_p7 }
 0x133   : > { %840 = shalt.err (!%p837_p11)
}
 0x134   : > { %574 = dma.vmem_to_hbm [thread:$0]  (%p714_p12), %s570_s11, %s568_s10, %s572_s3, %s1025_s29  }
 0x135 PF: > { %p755_p13 = scmp.ge.s32.totalorder %s876_s20, 2  ;;  %s583_s8 = sand.u32 1, %s864_s17  }
 0x136   : > { %s584_s9 = scalar_lea.sflag [#allocation4], %s583_s8 }
 0x137   : > { %p752_p0 = pnand %p755_p13, %p951_p6 }
 0x139   : > { %p753_p1 = pneg %p752_p0 }
 0x13b   : > { %859 = dma.done.wait (%p753_p1), %s584_s9, 32  }
 0x13c   : > { %861 = vsyncadd (%p753_p1), %s584_s9, 4294967264  ;;  %p15_p2 = scmp.ge.s32.totalorder %s934_s22, 4   ;;  %s1089_s17 = smov %s868_s18 }
 0x13d   : > { %s1090_s18 = smov %s872_s19  ;;  %s1091_s19 = smov %s945_s25 }
 0x13e   : > { %s1092_s20 = smov %s934_s22  ;;  %17 = sbr.rel (!%p15_p2) target bundleno = 5 (0x5), region = 71 }
 0x143   :  { %590 = vsyncpa [#allocation4], 1 }
 0x144   :  { %592 = vsyncpa [#allocation4 + $0x1], 1 }

</bundles_post_ra>
